<compile_context>
chip_gen: v7x
topology: tpu7x:2x2x1
jax: 0.10.0
libtpu: 0.0.40
codegen_flags: <defaults>
</compile_context>

<pallas_src>
import jax
import jax.numpy as jnp
from jax.experimental import pallas as pl
from jax.experimental.pallas import tpu as pltpu


def _round_up(n, m):
    return ((n + m - 1) // m) * m


def _mlp_kernel(x_ref, w1_ref, b1_ref, w2_ref, b2_ref, w3_ref, b3_ref, o_ref):
    mxu_dtype = w1_ref.dtype                      # bf16 (MXU operands only)
    x = x_ref[...].astype(mxu_dtype)              # in-kernel cast; x streams in native dtype

    # Layer 1: lane-dense (TBp, 128) @ (128, 128) on the MXU, f32 accumulation.
    h = jnp.dot(x, w1_ref[...], preferred_element_type=jnp.float32)
    h = jnp.maximum(h + b1_ref[...], 0.0)         # bias + ReLU in f32 (v5e-safe)

    # Layer 2.
    h = jnp.dot(h.astype(mxu_dtype), w2_ref[...], preferred_element_type=jnp.float32)
    h = jnp.maximum(h + b2_ref[...], 0.0)

    # Output layer (32 -> 1), lane-packed: (TBp, 128) @ (128, pack) MXU matmul
    # produces the packed (TBp, pack) output directly (no XLU lane-reduce).
    z = jnp.dot(h.astype(mxu_dtype), w3_ref[...], preferred_element_type=jnp.float32)
    z = z + b3_ref[...]

    # Sigmoid: exp on the EUP; divide replaced by EUP approx reciprocal.
    o_ref[...] = (pl.reciprocal(1.0 + jnp.exp(-z), approx=True)).astype(o_ref.dtype)


def prepare_params(params, compute_dtype=jnp.bfloat16):
    """One-time weight prep (outside the forward pass).

    Builds the lane-packed block weights:
      w1: block_diag(W1.T) * pack      -> (pack*d0, pack*d1)
      w2: block_diag(W2.T) * pack      -> (pack*d1, pack*d2)
      w3: block columns of W3.T        -> (pack*d2, pack)
    and tiles the biases to the packed lane layout.  pack = 128 // in_dim
    (falls back to 1 if in_dim does not divide 128).
    """
    w1, b1 = params["w1"], params["b1"]   # (d1, d0), (d1,)
    w2, b2 = params["w2"], params["b2"]   # (d2, d1), (d2,)
    w3, b3 = params["w3"], params["b3"]   # (1,  d2), (1,)
    d0 = w1.shape[1]

    pack = (128 // d0) if (d0 <= 128 and 128 % d0 == 0) else 1
    eye = jnp.eye(pack, dtype=jnp.float32)
    blk = lambda w: jnp.kron(eye, w.astype(jnp.float32))   # block-diagonal copies

    return {
        "in_dim": d0,
        "pack": pack,
        "w1": blk(w1.T).astype(compute_dtype),                        # (pack*d0, pack*d1)
        "b1": jnp.tile(b1, pack)[None, :].astype(jnp.float32),        # (1, pack*d1)
        "w2": blk(w2.T).astype(compute_dtype),                        # (pack*d1, pack*d2)
        "b2": jnp.tile(b2, pack)[None, :].astype(jnp.float32),        # (1, pack*d2)
        "w3": blk(w3.T).astype(compute_dtype),                        # (pack*d2, pack)
        "b3": jnp.tile(b3.reshape(1, 1), (1, pack)).astype(jnp.float32),  # (1, pack)
    }


def neural_net3_forward(x, prep, *, tb=8192):
    """NeuralNet3 forward pass.

    x:    any shape whose total size is a multiple of in_dim (flattened like
          PyTorch's x.view(-1, in_dim)); passed in its native dtype.
    prep: output of prepare_params().
    tb:   logical batch rows per grid step (packed rows = tb // pack).
    """
    in_dim = prep["in_dim"]
    pack = prep["pack"]
    lane_in = pack * in_dim

    x2d = x.reshape(-1, in_dim)           # free view-style reshape, no dtype cast
    B = x2d.shape[0]

    # Lane-pack `pack` batch rows per 128-lane row.  Row-major reshape is free
    # when B % pack == 0; otherwise pad at most pack-1 tail rows.
    # TODO(synk): the rare B % pack != 0 jnp.pad still rewrites x; could be
    # avoided with a separate tiny tail input if it ever matters.
    Bal = _round_up(max(B, 1), pack)
    if Bal != B:
        x2d = jnp.pad(x2d, ((0, Bal - B), (0, 0)))
    Rp = Bal // pack
    xp = x2d.reshape(Rp, lane_in)

    # Packed batch tile: ~tb logical rows per grid step; cap so there are >= 2
    # grid tiles when possible (v7x megacore), sublane-aligned to 8.  The grid
    # uses cdiv -> no full-array pad; Pallas masks the partial last tile.
    if Rp <= 8:
        tbp = Rp
    else:
        tbp = min(_round_up(max(tb // pack, 8), 8),       # requested tile
                  _round_up(pl.cdiv(Rp, 2), 8))            # >= 2 tiles for 2 TCs
        tbp = max(tbp, 8)
    grid = (pl.cdiv(Rp, tbp),)

    # Weights/biases: constant block index -> stay VMEM-resident across grid steps.
    def resident(arr):
        return pl.BlockSpec(arr.shape, lambda i: (0, 0))

    out = pl.pallas_call(
        _mlp_kernel,
        out_shape=jax.ShapeDtypeStruct((Rp, pack), jnp.float32),
        grid_spec=pltpu.PrefetchScalarGridSpec(
            num_scalar_prefetch=0,
            grid=grid,
            in_specs=[
                pl.BlockSpec((tbp, lane_in), lambda i: (i, 0)),   # streamed x tile
                resident(prep["w1"]), resident(prep["b1"]),
                resident(prep["w2"]), resident(prep["b2"]),
                resident(prep["w3"]), resident(prep["b3"]),
            ],
            out_specs=pl.BlockSpec((tbp, pack), lambda i: (i, 0)),
        ),
        compiler_params=pltpu.CompilerParams(
            dimension_semantics=("parallel",),        # megacore-shard batch axis (v7x)
            vmem_limit_bytes=32 * 1024 * 1024,        # ample headroom on v5e/v6e/v7x
        ),
    )(xp, prep["w1"], prep["b1"], prep["w2"], prep["b2"], prep["w3"], prep["b3"])

    out = out.reshape(Bal, 1)                # unpack (Rp, pack) -> (Bal, 1), free
    if Bal != B:
        out = out[:B]
    return out


def init_params(layers_size, key):
    """Deterministic PyTorch-style uniform(-1/sqrt(fan_in), 1/sqrt(fan_in)) init."""
    d0, d1, d2 = layers_size
    ks = jax.random.split(key, 6)

    def lin(kw, kb, fan_in, fan_out):
        bound = 1.0 / (fan_in ** 0.5)
        w = jax.random.uniform(kw, (fan_out, fan_in), jnp.float32, -bound, bound)
        b = jax.random.uniform(kb, (fan_out,), jnp.float32, -bound, bound)
        return w, b

    w1, b1 = lin(ks[0], ks[1], d0, d1)
    w2, b2 = lin(ks[2], ks[3], d1, d2)
    w3, b3 = lin(ks[4], ks[5], d2, 1)
    return {"w1": w1, "b1": b1, "w2": w2, "b2": b2, "w3": w3, "b3": b3}


def _reference_f32(x, params):
    """Pure-f32 reference (exact PyTorch semantics)."""
    in_dim = params["w1"].shape[1]
    h = x.reshape(-1, in_dim).astype(jnp.float32)
    h = jnp.maximum(h @ params["w1"].T + params["b1"], 0.0)
    h = jnp.maximum(h @ params["w2"].T + params["b2"], 0.0)
    z = h @ params["w3"].T + params["b3"]
    return 1.0 / (1.0 + jnp.exp(-z))


def _reference_bf16(x, params):
    """Reference that mirrors the kernel's bf16 MXU-operand casts (tight check)."""
    in_dim = params["w1"].shape[1]
    q = lambda a: a.astype(jnp.bfloat16).astype(jnp.float32)
    h = q(x.reshape(-1, in_dim))
    h = jnp.maximum(h @ q(params["w1"].T) + params["b1"][None, :], 0.0)
    h = jnp.maximum(q(h) @ q(params["w2"].T) + params["b2"][None, :], 0.0)
    z = q(h) @ q(params["w3"].T) + params["b3"][None, :]
    return 1.0 / (1.0 + jnp.exp(-z))


if __name__ == "__main__":
    key = jax.random.PRNGKey(0)
    k_params, k_x, k_x2 = jax.random.split(key, 3)

    layers_size = [32, 32, 32]   # [in_dim, hidden1, hidden2]; output dim is 1
    batch = 8

    params = init_params(layers_size, k_params)
    prep = prepare_params(params)   # one-time weight prep (block-diag packing, bf16 cast)

    # Small deterministic test input.
    x = jax.random.normal(k_x, (batch, layers_size[0]), jnp.float32)
    out = jax.block_until_ready(neural_net3_forward(x, prep))
    assert out.shape == (batch, 1), out.shape
    assert jnp.allclose(out, _reference_bf16(x, params), atol=1e-2), "mismatch vs bf16 reference"
    assert jnp.allclose(out, _reference_f32(x, params), atol=3e-2), "mismatch vs f32 reference"

    # Ragged batch (not a multiple of the pack factor or the tile) with a small
    # logical tile: exercises lane packing, the partial last grid tile, and the
    # <= pack-1 row tail pad.
    x2 = jax.random.normal(k_x2, (301, layers_size[0]), jnp.float32)
    out2 = jax.block_until_ready(neural_net3_forward(x2, prep, tb=128))
    assert out2.shape == (301, 1), out2.shape
    assert jnp.allclose(out2, _reference_bf16(x2, params), atol=1e-2), "mismatch on packed/ragged path"

    print("KERNEL_OK")
</pallas_src>

<mosaic_0001>
module attributes {stable_mosaic.version = 11 : i64} {
  func.func @_mlp_kernel(%arg0: i32, %arg1: memref<2x128xf32, #tpu.memory_space<vmem>>, %arg2: memref<128x128xbf16, #tpu.memory_space<vmem>>, %arg3: memref<1x128xf32, #tpu.memory_space<vmem>>, %arg4: memref<128x128xbf16, #tpu.memory_space<vmem>>, %arg5: memref<1x128xf32, #tpu.memory_space<vmem>>, %arg6: memref<128x4xbf16, #tpu.memory_space<vmem>>, %arg7: memref<1x4xf32, #tpu.memory_space<vmem>>, %arg8: memref<2x4xf32, #tpu.memory_space<vmem>>) attributes {dimension_semantics = [#tpu.dimension_semantics<parallel>], iteration_bounds = array<i64: 1>, scalar_prefetch = 0 : i64, scratch_operands = 0 : i64, tpu.core_type = #tpu.core_type<tc>, window_params = [{transform_indices = @transform_0, window_bounds = array<i64: 2, 128>}, {pipeline_mode = #tpu.pipeline_mode<synchronous>, transform_indices = @transform_1, window_bounds = array<i64: 128, 128>}, {pipeline_mode = #tpu.pipeline_mode<synchronous>, transform_indices = @transform_2, window_bounds = array<i64: 1, 128>}, {pipeline_mode = #tpu.pipeline_mode<synchronous>, transform_indices = @transform_3, window_bounds = array<i64: 128, 128>}, {pipeline_mode = #tpu.pipeline_mode<synchronous>, transform_indices = @transform_4, window_bounds = array<i64: 1, 128>}, {pipeline_mode = #tpu.pipeline_mode<synchronous>, transform_indices = @transform_5, window_bounds = array<i64: 128, 4>}, {pipeline_mode = #tpu.pipeline_mode<synchronous>, transform_indices = @transform_6, window_bounds = array<i64: 1, 4>}, {transform_indices = @transform_7, window_bounds = array<i64: 2, 4>}]} {
    %c0 = arith.constant 0 : index
    %c0_0 = arith.constant 0 : index
    %0 = vector.load %arg1[%c0, %c0_0] : memref<2x128xf32, #tpu.memory_space<vmem>>, vector<2x128xf32>
    %1 = arith.truncf %0 : vector<2x128xf32> to vector<2x128xbf16>
    %c0_1 = arith.constant 0 : index
    %c0_2 = arith.constant 0 : index
    %2 = vector.load %arg2[%c0_1, %c0_2] : memref<128x128xbf16, #tpu.memory_space<vmem>>, vector<128x128xbf16>
    %cst = arith.constant dense<0.000000e+00> : vector<2x128xf32>
    %3 = tpu.matmul %1, %2, %cst {dimension_numbers = #tpu.dot_dimension_numbers<[1], [0], [0], [1], [0, 0, 1, 1], [], []>} : vector<2x128xbf16>, vector<128x128xbf16>, vector<2x128xf32> -> vector<2x128xf32>
    %c0_3 = arith.constant 0 : index
    %c0_4 = arith.constant 0 : index
    %4 = vector.load %arg3[%c0_3, %c0_4] : memref<1x128xf32, #tpu.memory_space<vmem>>, vector<1x128xf32>
    %5 = vector.broadcast %4 : vector<1x128xf32> to vector<2x128xf32>
    %6 = arith.addf %3, %5 : vector<2x128xf32>
    %cst_5 = arith.constant 0.000000e+00 : f32
    %7 = vector.broadcast %cst_5 : f32 to vector<2x128xf32>
    %8 = arith.maximumf %6, %7 : vector<2x128xf32>
    %9 = arith.truncf %8 : vector<2x128xf32> to vector<2x128xbf16>
    %c0_6 = arith.constant 0 : index
    %c0_7 = arith.constant 0 : index
    %10 = vector.load %arg4[%c0_6, %c0_7] : memref<128x128xbf16, #tpu.memory_space<vmem>>, vector<128x128xbf16>
    %cst_8 = arith.constant dense<0.000000e+00> : vector<2x128xf32>
    %11 = tpu.matmul %9, %10, %cst_8 {dimension_numbers = #tpu.dot_dimension_numbers<[1], [0], [0], [1], [0, 0, 1, 1], [], []>} : vector<2x128xbf16>, vector<128x128xbf16>, vector<2x128xf32> -> vector<2x128xf32>
    %c0_9 = arith.constant 0 : index
    %c0_10 = arith.constant 0 : index
    %12 = vector.load %arg5[%c0_9, %c0_10] : memref<1x128xf32, #tpu.memory_space<vmem>>, vector<1x128xf32>
    %13 = vector.broadcast %12 : vector<1x128xf32> to vector<2x128xf32>
    %14 = arith.addf %11, %13 : vector<2x128xf32>
    %cst_11 = arith.constant 0.000000e+00 : f32
    %15 = vector.broadcast %cst_11 : f32 to vector<2x128xf32>
    %16 = arith.maximumf %14, %15 : vector<2x128xf32>
    %17 = arith.truncf %16 : vector<2x128xf32> to vector<2x128xbf16>
    %c0_12 = arith.constant 0 : index
    %c0_13 = arith.constant 0 : index
    %18 = vector.load %arg6[%c0_12, %c0_13] : memref<128x4xbf16, #tpu.memory_space<vmem>>, vector<128x4xbf16>
    %cst_14 = arith.constant dense<0.000000e+00> : vector<2x4xf32>
    %19 = tpu.matmul %17, %18, %cst_14 {dimension_numbers = #tpu.dot_dimension_numbers<[1], [0], [0], [1], [0, 0, 1, 1], [], []>} : vector<2x128xbf16>, vector<128x4xbf16>, vector<2x4xf32> -> vector<2x4xf32>
    %c0_15 = arith.constant 0 : index
    %c0_16 = arith.constant 0 : index
    %20 = vector.load %arg7[%c0_15, %c0_16] : memref<1x4xf32, #tpu.memory_space<vmem>>, vector<1x4xf32>
    %21 = vector.broadcast %20 : vector<1x4xf32> to vector<2x4xf32>
    %22 = arith.addf %19, %21 : vector<2x4xf32>
    %cst_17 = arith.constant 0.000000e+00 : f32
    %23 = vector.broadcast %cst_17 : f32 to vector<2x4xf32>
    %24 = arith.subf %23, %22 : vector<2x4xf32>
    %25 = math.exp %24 : vector<2x4xf32>
    %cst_18 = arith.constant 1.000000e+00 : f32
    %26 = vector.broadcast %cst_18 : f32 to vector<2x4xf32>
    %27 = arith.addf %26, %25 : vector<2x4xf32>
    %28 = tpu.reciprocal %27 {approx = true} : vector<2x4xf32> -> vector<2x4xf32>
    %c0_19 = arith.constant 0 : index
    %c0_20 = arith.constant 0 : index
    %29 = vector.load %arg8[%c0_19, %c0_20] : memref<2x4xf32, #tpu.memory_space<vmem>>, vector<2x4xf32>
    tpu.vector_store %arg8[%c0_19, %c0_20], %28 {strides = array<i32>} : memref<2x4xf32, #tpu.memory_space<vmem>>, vector<2x4xf32>,
    return
  }
  func.func @transform_0(%arg0: i32) -> (i32, i32) {
    %c0_i32 = arith.constant 0 : i32
    %c0_i32_0 = arith.constant 0 : i32
    return %arg0, %c0_i32 : i32, i32
  }
  func.func @transform_1(%arg0: i32) -> (i32, i32) {
    %c0_i32 = arith.constant 0 : i32
    %c0_i32_0 = arith.constant 0 : i32
    %c0_i32_1 = arith.constant 0 : i32
    return %c0_i32, %c0_i32_0 : i32, i32
  }
  func.func @transform_2(%arg0: i32) -> (i32, i32) {
    %c0_i32 = arith.constant 0 : i32
    %c0_i32_0 = arith.constant 0 : i32
    %c0_i32_1 = arith.constant 0 : i32
    return %c0_i32, %c0_i32_0 : i32, i32
  }
  func.func @transform_3(%arg0: i32) -> (i32, i32) {
    %c0_i32 = arith.constant 0 : i32
    %c0_i32_0 = arith.constant 0 : i32
    %c0_i32_1 = arith.constant 0 : i32
    return %c0_i32, %c0_i32_0 : i32, i32
  }
  func.func @transform_4(%arg0: i32) -> (i32, i32) {
    %c0_i32 = arith.constant 0 : i32
    %c0_i32_0 = arith.constant 0 : i32
    %c0_i32_1 = arith.constant 0 : i32
    return %c0_i32, %c0_i32_0 : i32, i32
  }
  func.func @transform_5(%arg0: i32) -> (i32, i32) {
    %c0_i32 = arith.constant 0 : i32
    %c0_i32_0 = arith.constant 0 : i32
    %c0_i32_1 = arith.constant 0 : i32
    return %c0_i32, %c0_i32_0 : i32, i32
  }
  func.func @transform_6(%arg0: i32) -> (i32, i32) {
    %c0_i32 = arith.constant 0 : i32
    %c0_i32_0 = arith.constant 0 : i32
    %c0_i32_1 = arith.constant 0 : i32
    return %c0_i32, %c0_i32_0 : i32, i32
  }
  func.func @transform_7(%arg0: i32) -> (i32, i32) {
    %c0_i32 = arith.constant 0 : i32
    %c0_i32_0 = arith.constant 0 : i32
    return %arg0, %c0_i32 : i32, i32
  }
}

</mosaic_0001>

<bundles_post_ra>
// kernel: tpu_custom_call.1
= control target key start
LH: loop header
LB: loop body
LE: loop exit
PB: predicated region body
PF: predicated region fallthrough
CT: control target
= control target key end

     0   :  { %12 = vsyncpa [#allocation3], 0  ;;  %s759_s0 = inlined_call_operand.vmem [shape: f32[2,128], index: 0, kind: input, shape index: {}]   ;;  %s760_s1 = inlined_call_operand.vmem [shape: bf16[128,128], index: 1, kind: input, shape index: {}]   ;;  %s761_s2 = inlined_call_operand.vmem [shape: f32[1,128], index: 2, kind: input, shape index: {}]   ;;  %s762_s3 = inlined_call_operand.hbm [shape: bf16[128,128], index: 3, kind: input, shape index: {}]   ;;  %s763_s4 = inlined_call_operand.vmem [shape: f32[1,128], index: 4, kind: input, shape index: {}]   ;;  %s764_s5 = inlined_call_operand.vmem [shape: bf16[128,4], index: 5, kind: input, shape index: {}]   ;;  %s765_s6 = inlined_call_operand.vmem [shape: f32[1,4], index: 6, kind: input, shape index: {}]   ;;  %s766_s7 = inlined_call_operand.hbm [shape: f32[2,4], index: 7, kind: output, shape index: {}]  }
   0x1   :  { %13 = vsyncpa [#allocation4], 0  ;;  %s599_s24 = smov [#allocation2]   ;;  %s551_s28 = scalar_lea.hbm %s762_s3, 1024 }
   0x2   :  { %s25_s25 = sshll.u32 %s599_s24, 4  ;;  %p552_p0 = scmp.ne.s32.totalorder %s762_s3, %s551_s28  ;;  %s26_s25 = int_to_ptr.vmem [resolvable:$true] %s25_s25 }
   0x3   :  { %p555_p1 = scmp.lt.u32.totalorder %s551_s28, %s762_s3 }
   0x5   :  { %p557_p2 = pnand %p555_p1, %p552_p0 }
   0x7   :  { %560 = shalt.err (!%p557_p2)
}
   0x8   :  { %s561_s10 = scalar_lea.vmem %s26_s25, 1024  ;;  %p566_p4 = scmp.lt.s32.totalorder %s26_s25, %s26_s25 }
   0x9   :  { %p562_p3 = scmp.ne.s32.totalorder %s26_s25, %s561_s10  ;;  %p567_p5 = scmp.lt.s32.totalorder %s561_s10, %s561_s10 }
   0xb   :  { %p568_p6 = por %p567_p5, %p566_p4 }
   0xd   :  { %p569_p7 = pnand %p568_p6, %p562_p3 }
   0xf   :  { %572 = shalt.err (!%p569_p7)
}
  0x10   :  { %s600_s11 = smov 64   ;;  %s601_s12 = smov 4  }
  0x11   :  { %31 = dma.hbm_to_vmem [thread:$0]  %s762_s3, 1024, %s26_s25, [#allocation3], %s600_s11, %s600_s11, %s601_s12  }
  0x12   :  { %595 = dma.done.wait [#allocation3], 1024  }
  0x13   :  { %596 = vsyncadd [#allocation3], 4294966272  ;;  %v602_v0 = vmov 0.0   ;;  %vm603_vm0 = vmmov 0   ;;  %v523_v1 = vld [vmem:[%s760_s1] sm:$0xff]   ;;  %v524_v2 = vld [vmem:[%s760_s1 + $0x8] sm:$0xff]  }
  0x14   :  { %457 = vmatprep.subr.bf16.mxu0 %v602_v0  ;;  %473 = vmatprep.mubr.msk.bf16.mxu0 %vm603_vm0, %v602_v0  ;;  %v525_v3 = vld [vmem:[%s760_s1 + $0x10] sm:$0xff]   ;;  %v531_v4 = vld [vmem:[#allocation2] sm:$0xff]   ;;  %v526_v5 = vld [vmem:[%s760_s1 + $0x18] sm:$0xff]   ;;  %vm386_vm1 = vcmask 25600  }
  0x15   :  { %477 = vmatprep.subr.bf16.mxu1 %v602_v0  ;;  %493 = vmatprep.mubr.msk.bf16.mxu1 %vm603_vm0, %v602_v0  ;;  %v532_v6 = vld [vmem:[#allocation2 + $0x8] sm:$0xff]   ;;  %v527_v7 = vld [vmem:[%s760_s1 + $0x20] sm:$0xff]   ;;  %v533_v8 = vld [vmem:[#allocation2 + $0x10] sm:$0xff]  }
  0x16   :  { %458 = vmatpush3.bf16.msra.mxu0 %v523_v1  ;;  %478 = vmatpush3.bf16.msra.mxu1 %v531_v4  ;;  %v528_v9 = vld [vmem:[%s760_s1 + $0x28] sm:$0xff]   ;;  %v534_v10 = vld [vmem:[#allocation2 + $0x18] sm:$0xff]   ;;  %v529_v11 = vld [vmem:[%s760_s1 + $0x30] sm:$0xff]  }
  0x17   :  { %459 = vmatprep.subr.bf16.mxu0 %v602_v0  ;;  %479 = vmatprep.subr.bf16.mxu1 %v602_v0  ;;  %v535_v12 = vld [vmem:[#allocation2 + $0x20] sm:$0xff]   ;;  %v530_v13 = vld [vmem:[%s760_s1 + $0x38] sm:$0xff]   ;;  %v536_v15 = vld [vmem:[#allocation2 + $0x28] sm:$0xff]  }
  0x18   :  { %v42_v14 = vld [vmem:[%s759_s0] sm:$0x3]  ;;  %v537_v17 = vld [vmem:[#allocation2 + $0x30] sm:$0xff]   ;;  %v538_v18 = vld [vmem:[#allocation2 + $0x38] sm:$0xff]  }
  0x19   :  { %v43_v16 = vpack.c.bf16 %v42_v14, %v42_v14  ;;  %v539_v19 = vld [vmem:[%s764_s5] sm:$0xff]   ;;  %v540_v20 = vld [vmem:[%s764_s5 + $0x8] sm:$0xff]   ;;  %v541_v21 = vld [vmem:[%s764_s5 + $0x10] sm:$0xff]  }
  0x1a   :  { %460 = vmatpush3.bf16.msra.mxu0 %v524_v2  ;;  %480 = vmatpush3.bf16.msra.mxu1 %v532_v6  ;;  %v542_v22 = vld [vmem:[%s764_s5 + $0x18] sm:$0xff]   ;;  %v543_v23 = vld [vmem:[%s764_s5 + $0x20] sm:$0xff]   ;;  %v544_v24 = vld [vmem:[%s764_s5 + $0x28] sm:$0xff]  }
  0x1b   :  { %461 = vmatprep.subr.bf16.mxu0 %v602_v0  ;;  %481 = vmatprep.subr.bf16.mxu1 %v602_v0  ;;  %v403_v25 = vld [vmem:[%s761_s2] ss:$0 sm:$0xff]  ;;  %v545_v33 = vld [vmem:[%s764_s5 + $0x30] sm:$0xff]   ;;  %v546_v34 = vld [vmem:[%s764_s5 + $0x38] sm:$0xff]  }
  0x1c   :  { %v412_v35 = vld [vmem:[%s763_s4] ss:$0 sm:$0xff]  ;;  %s604_s4 = smov [#allocation5]  }
  0x1d   :  { %v421_v43 = vld [vmem:[%s765_s6] ss:$0 sm:$0xff]  ;;  %s394_s5 = sshll.u32 %s604_s4, 4  ;;  %s395_s5 = int_to_ptr.vmem [resolvable:$true] %s394_s5 }
  0x1e   :  { %462 = vmatpush3.bf16.msra.mxu0 %v525_v3  ;;  %482 = vmatpush3.bf16.msra.mxu1 %v533_v8  ;;  %s573_s27 = scalar_lea.vmem %s395_s5, 32  ;;  %p578_p9 = scmp.lt.s32.totalorder %s395_s5, %s395_s5 }
  0x1f   :  { %463 = vmatprep.subr.bf16.mxu0 %v602_v0  ;;  %483 = vmatprep.subr.bf16.mxu1 %v602_v0  ;;  %p574_p8 = scmp.ne.s32.totalorder %s395_s5, %s573_s27  ;;  %p579_p10 = scmp.lt.s32.totalorder %s573_s27, %s573_s27 }
  0x21   :  { %p580_p11 = por %p579_p10, %p578_p9 }
  0x22   :  { %464 = vmatpush3.bf16.msra.mxu0 %v526_v5  ;;  %484 = vmatpush3.bf16.msra.mxu1 %v534_v10 }
  0x23   :  { %465 = vmatprep.subr.bf16.mxu0 %v602_v0  ;;  %485 = vmatprep.subr.bf16.mxu1 %v602_v0  ;;  %p581_p12 = pnand %p580_p11, %p574_p8 }
  0x26   :  { %466 = vmatpush3.bf16.msra.mxu0 %v527_v7  ;;  %486 = vmatpush3.bf16.msra.mxu1 %v535_v12 }
  0x27   :  { %467 = vmatprep.subr.bf16.mxu0 %v602_v0  ;;  %487 = vmatprep.subr.bf16.mxu1 %v602_v0 }
  0x2a   :  { %468 = vmatpush3.bf16.msra.mxu0 %v528_v9  ;;  %488 = vmatpush3.bf16.msra.mxu1 %v536_v15 }
  0x2b   :  { %469 = vmatprep.subr.bf16.mxu0 %v602_v0  ;;  %489 = vmatprep.subr.bf16.mxu1 %v602_v0 }
  0x2e   :  { %470 = vmatpush3.bf16.msra.mxu0 %v529_v11  ;;  %490 = vmatpush3.bf16.msra.mxu1 %v537_v17 }
  0x2f   :  { %471 = vmatprep.subr.bf16.mxu0 %v602_v0  ;;  %491 = vmatprep.subr.bf16.mxu1 %v602_v0 }
  0x32   :  { %472 = vmatpush3.bf16.msra.mxu0 %v530_v13  ;;  %492 = vmatpush3.bf16.msra.mxu1 %v538_v18 }
  0x33   :  { %497 = vmatprep.subr.bf16.mxu0 %v602_v0 }
  0x35   :  { %474 = vmatmul.mubr.bf16.vlgmr.msra.gmra.mrb[0].mxu0 %v43_v16 }
  0x36   :  { %513 = vmatprep.mubr.msk.bf16.mxu0 %vm603_vm0, %v602_v0  ;;  %498 = vmatpush3.bf16.msra.mxu0 %v539_v19 }
  0x37   :  { %499 = vmatprep.subr.bf16.mxu0 %v602_v0 }
  0x3a   :  { %500 = vmatpush3.bf16.msra.mxu0 %v540_v20 }
  0x3b   :  { %501 = vmatprep.subr.bf16.mxu0 %v602_v0 }
  0x3e   :  { %502 = vmatpush3.bf16.msra.mxu0 %v541_v21 }
  0x3f   :  { %503 = vmatprep.subr.bf16.mxu0 %v602_v0 }
  0x42   :  { %504 = vmatpush3.bf16.msra.mxu0 %v542_v22 }
  0x43   :  { %505 = vmatprep.subr.bf16.mxu0 %v602_v0 }
  0x46   :  { %506 = vmatpush3.bf16.msra.mxu0 %v543_v23 }
  0x47   :  { %507 = vmatprep.subr.bf16.mxu0 %v602_v0 }
  0x4a   :  { %508 = vmatpush3.bf16.msra.mxu0 %v544_v24 }
  0x4b   :  { %509 = vmatprep.subr.bf16.mxu0 %v602_v0 }
  0x4e   :  { %510 = vmatpush3.bf16.msra.mxu0 %v545_v33 }
  0x4f   :  { %511 = vmatprep.subr.bf16.mxu0 %v602_v0 }
  0x52   :  { %512 = vmatpush3.bf16.msra.mxu0 %v546_v34 }
 0x108   :  { %v149_v26 = vpop.f32.mrb[0].mxu0 }
 0x109   :  { %v150_v27 = vadd.f32 %v403_v25, %v149_v26  ;;  %v475_v28 = vpop.f32.mrb[1].mxu0 }
 0x10a   :  { %v152_v29 = vpop.f32.mrb[2].mxu0 }
 0x10b   :  { %v155_v30 = vmax.f32 %v150_v27, 0.0  ;;  %v476_v31 = vpop.f32.mrb[3].mxu0 }
 0x10d   :  { %v156_v32 = vpack.c.bf16 %v155_v30, %v155_v30 }
 0x10f   :  { %494 = vmatmul.mubr.bf16.vlgmr.msra.gmra.mrb[0].mxu1 %v156_v32 }
 0x1e2   :  { %v262_v36 = vpop.f32.mrb[0].mxu1 }
 0x1e3   :  { %v263_v37 = vadd.f32 %v412_v35, %v262_v36  ;;  %v495_v38 = vpop.f32.mrb[1].mxu1 }
 0x1e4   :  { %v265_v39 = vpop.f32.mrb[2].mxu1 }
 0x1e5   :  { %v268_v40 = vmax.f32 %v263_v37, 0.0  ;;  %v496_v41 = vpop.f32.mrb[3].mxu1 }
 0x1e7   :  { %v269_v42 = vpack.c.bf16 %v268_v40, %v268_v40 }
 0x1e9   :  { %514 = vmatmul.mubr.bf16.vlgmr.msra.gmra.mrb[4].mxu0 %v269_v42 }
 0x2bc   :  { %v375_v44 = vpop.f32.mrb[4].mxu0 }
 0x2bd   :  { %v376_v45 = vadd.f32 %v421_v43, %v375_v44  ;;  %v515_v46 = vpop.f32.mrb[5].mxu0 }
 0x2be   :  { %v378_v47 = vpop.f32.mrb[6].mxu0 }
 0x2bf   :  { %v381_v48 = vsub.f32 0.0, %v376_v45  ;;  %v516_v49 = vpop.f32.mrb[7].mxu0 }
 0x2c1   :  { %v382_v50 = vmul.f32 1.442695, %v381_v48 }
 0x2c3   :  { %547 = vpow2.f32 %v382_v50 }
 0x2cd   :  { %v548_v51 = vpop.eup %547 }
 0x2ce   :  { %v384_v52 = vadd.f32 1.0, %v548_v51 }
 0x2d0   :  { %549 = vrcp.f32 %v384_v52 }
 0x2da   :  { %v550_v53 = vpop.eup %549 }
 0x2db   :  { %387 = vst.msk [vmem:[#allocation5] sm:$0x3] %vm386_vm1, %v550_v53 }
 0x2dc   :  { %584 = shalt.err (!%p581_p12)
}
 0x2dd   :  { %s585_s29 = scalar_lea.hbm %s766_s7, 32 }
 0x2de   :  { %p586_p13 = scmp.ne.s32.totalorder %s766_s7, %s585_s29  ;;  %p589_p0 = scmp.lt.u32.totalorder %s585_s29, %s766_s7 }
 0x2e0   :  { %p591_p1 = pnand %p589_p0, %p586_p13 }
 0x2e2   :  { %594 = shalt.err (!%p591_p1)
}
 0x2e3   :  { %397 = dma.vmem_to_hbm [thread:$0]  %s395_s5, 32, %s766_s7, [#allocation4]  }
 0x2e4   :  { %597 = dma.done.wait [#allocation4], 32  }
 0x2e5   :  { %598 = vsyncadd [#allocation4], 4294967264 }
 0x2e6   :  { %401 = vsyncpa [#allocation3], 1 }
 0x2e7   :  { %402 = vsyncpa [#allocation4], 1 }

</bundles_post_ra>
